<compile_context>
chip_gen: v6e
topology: v6e:2x2x1
jax: 0.10.0
libtpu: 0.0.40
codegen_flags: <defaults>
</compile_context>

<pallas_src>
import math

import jax
import jax.numpy as jnp
from jax import lax
from jax.experimental import pallas as pl
from jax.experimental.pallas import tpu as pltpu


# ----------------------------- model config ---------------------------------
VOCAB = 32        # vocabulary size
BLOCK = 8         # block_size (max sequence length)
D = 32            # n_embd
DFF = 4 * D       # MLP hidden (= 128)
VPAD = 128        # lane-dense padded vocab / fused-QKV width
LN_EPS = 1e-5

# rows of the packed "vecs" operand (16, 128); D-wide params live in lanes [:D]
_LN1W, _LN1B, _BO, _LN2W, _LN2B, _B2, _LNFW, _LNFB, _BQKV, _B1 = range(10)
_VECS_ROWS = 16


def _gelu(x):
    # TODO(synk): nn.GELU default is the exact erf form; tanh approx differs ~1e-3.
    c = math.sqrt(2.0 / math.pi)
    return 0.5 * x * (1.0 + jnp.tanh(c * (x + 0.044715 * x * x * x)))


def _layernorm(x, w, b):
    mu = jnp.mean(x, axis=-1, keepdims=True)
    var = jnp.mean((x - mu) ** 2, axis=-1, keepdims=True)
    return (x - mu) * lax.rsqrt(var + LN_EPS) * w + b


# ------------------------------ Pallas kernel --------------------------------
def fused_forward_kernel(
    idx_ref,      # (rows, 1)        int32 token ids (flattened batch chunk)
    emb_ref,      # (VOCAB + T, D)   f32  [wte; wpe] packed embedding tables
    wqkv_ref,     # (D, 128)         fused Q|K|V weight, Q pre-scaled by 1/sqrt(D)
    wo_ref,       # (D, D)
    w1_ref,       # (D, DFF)
    w2_ref,       # (DFF, D)
    whead_ref,    # (D, VPAD)        vocab padded to 128 lanes
    vecs_ref,     # (16, 128)        f32 packed LN params + biases
    logits_ref,   # (rows, VPAD)     f32
):
    N = idx_ref.shape[0]
    Dm = emb_ref.shape[1]
    T = emb_ref.shape[0] - VOCAB
    Bt = N // T
    wdt = wqkv_ref.dtype          # bf16 (v6e/v7x) or f32 (v5e)

    vecs = vecs_ref[...]          # (16, 128)
    vd = vecs[:, :Dm]             # D-wide params in the first Dm lanes
    bqkv = vecs[_BQKV]            # (128,) fused qkv bias (pad lanes are zero)
    b1 = vecs[_B1]                # (128,) MLP hidden bias

    # ---- fused token + position embedding (one-hot matmul gather, exact f32) ----
    emb = emb_ref[...]
    ids = idx_ref[...]                                              # (N, 1)
    oh = (ids == lax.broadcasted_iota(jnp.int32, (N, VOCAB), 1)).astype(jnp.float32)
    tok = jnp.dot(oh, emb[:VOCAB], preferred_element_type=jnp.float32)   # (N, D)
    pos = jnp.broadcast_to(emb[VOCAB:][None, :, :], (Bt, T, Dm)).reshape(N, Dm)
    x = tok + pos

    # ---- LayerNorm 1 + fused-QKV projection (single MXU dot) ----
    h = _layernorm(x, vd[_LN1W], vd[_LN1B])
    qkv = jnp.dot(h.astype(wdt), wqkv_ref[...],
                  preferred_element_type=jnp.float32) + bqkv
    qkv = qkv.astype(wdt)                                           # cast once
    q = qkv[:, 0 * Dm:1 * Dm].reshape(Bt, T, Dm)
    k = qkv[:, 1 * Dm:2 * Dm].reshape(Bt, T, Dm)
    v = qkv[:, 2 * Dm:3 * Dm].reshape(Bt, T, Dm)

    # ---- per-sample causal attention; simple iota compare (no div/mod) ----
    scores = jnp.einsum('bqd,bkd->bqk', q, k, preferred_element_type=jnp.float32)
    qi = lax.broadcasted_iota(jnp.int32, (T, T), 0)
    ki = lax.broadcasted_iota(jnp.int32, (T, T), 1)
    scores = jnp.where((ki <= qi)[None, :, :], scores, -1e30)

    m = jnp.max(scores, axis=-1, keepdims=True)
    p = jnp.exp(scores - m)
    att = (p * pl.reciprocal(jnp.sum(p, axis=-1, keepdims=True),
                             approx=True)).astype(wdt)
    a = jnp.einsum('bqk,bkd->bqd', att, v,
                   preferred_element_type=jnp.float32).reshape(N, Dm)
    attn_out = jnp.dot(a.astype(wdt), wo_ref[...],
                       preferred_element_type=jnp.float32) + vd[_BO]
    x = x + attn_out

    # ---- LayerNorm 2 + GELU MLP ----
    h2 = _layernorm(x, vd[_LN2W], vd[_LN2B])
    ff = _gelu(jnp.dot(h2.astype(wdt), w1_ref[...],
                       preferred_element_type=jnp.float32) + b1)
    x = x + jnp.dot(ff.astype(wdt), w2_ref[...],
                    preferred_element_type=jnp.float32) + vd[_B2]

    # ---- final LayerNorm + lm_head (lane-dense padded vocab, unmasked vst) ----
    hf = _layernorm(x, vd[_LNFW], vd[_LNFB])
    logits_ref[...] = jnp.dot(hf.astype(wdt), whead_ref[...],
                              preferred_element_type=jnp.float32)


# --------------------------- chip-aware config --------------------------------
def _chip_config():
    """(num_tensorcores_to_use, matmul_operand_dtype) — safe defaults on failure."""
    try:
        kind = jax.devices()[0].device_kind.lower()
    except Exception:
        kind = ""
    n_tc = 2 if ("v7" in kind or "7x" in kind) else 1     # megacore only on v7x
    mm_dtype = jnp.float32 if "v5" in kind else jnp.bfloat16
    return n_tc, mm_dtype


# ------------------------------ param packing ---------------------------------
def pack_params(params, mm_dtype=jnp.bfloat16):
    """Pack per-module params into fused / padded kernel operands (host, once)."""
    scale = 1.0 / math.sqrt(D)
    # fused QKV weight, Q columns (and bias) pre-scaled by 1/sqrt(D); pad to 128 lanes
    wqkv = jnp.concatenate(
        [params["wq"] * scale, params["wk"], params["wv"]], axis=1)     # (D, 3D)
    wqkv = (jnp.zeros((D, VPAD), jnp.float32)
            .at[:, :3 * D].set(wqkv).astype(mm_dtype))
    bqkv = jnp.concatenate(
        [params["bq"] * scale, params["bk"], params["bv"]], axis=1)     # (1, 3D)

    wo = params["wo"].astype(mm_dtype)
    w1 = params["w1"].astype(mm_dtype)
    w2 = params["w2"].astype(mm_dtype)
    whead = (jnp.zeros((D, VPAD), jnp.float32)
             .at[:, :VOCAB].set(params["whead"]).astype(mm_dtype))

    def row(v):
        v = jnp.asarray(v, jnp.float32).reshape(-1)
        return jnp.zeros((VPAD,), jnp.float32).at[:v.shape[0]].set(v)

    rows = [row(params["ln1_w"]), row(params["ln1_b"]), row(params["bo"]),
            row(params["ln2_w"]), row(params["ln2_b"]), row(params["b2"]),
            row(params["lnf_w"]), row(params["lnf_b"]),
            row(bqkv), row(params["b1"])]
    rows += [jnp.zeros((VPAD,), jnp.float32)] * (_VECS_ROWS - len(rows))
    vecs = jnp.stack(rows, axis=0)                                      # (16, 128)

    emb = jnp.concatenate([params["wte"], params["wpe"]],
                          axis=0).astype(jnp.float32)                   # (VOCAB+BLOCK, D)
    return dict(emb=emb, wqkv=wqkv, wo=wo, w1=w1, w2=w2,
                whead=whead, vecs=vecs)


# ------------------------------ forward wrapper --------------------------------
def transformer_forward(idx, packed, n_tc=1):
    """idx: (B, T) int32 token ids -> logits (B, T, VOCAB) f32."""
    B, T = idx.shape
    assert T <= BLOCK
    # Grid collapses to 1 on single-TC v5e/v6e; 2 only on v7x (two TensorCores).
    # TODO(synk): even on v7x, benchmark grid=1 vs 2 — at ~32 rows the ~0.35us
    # per-step overhead may exceed the megacore win.
    nsteps = n_tc if (n_tc > 1 and B % n_tc == 0) else 1
    rows = (B // nsteps) * T

    idx_flat = idx.reshape(B * T, 1).astype(jnp.int32)
    emb = packed["emb"][:VOCAB + T]
    wqkv, wo, w1, w2 = packed["wqkv"], packed["wo"], packed["w1"], packed["w2"]
    whead, vecs = packed["whead"], packed["vecs"]

    bcast = lambda shape: pl.BlockSpec(shape, lambda i: (0, 0))
    in_specs = [
        pl.BlockSpec((rows, 1), lambda i: (i, 0)),     # idx chunk
        bcast(emb.shape), bcast(wqkv.shape), bcast(wo.shape),
        bcast(w1.shape), bcast(w2.shape), bcast(whead.shape), bcast(vecs.shape),
    ]

    logits_pad = pl.pallas_call(
        fused_forward_kernel,
        out_shape=jax.ShapeDtypeStruct((B * T, VPAD), jnp.float32),
        grid_spec=pltpu.PrefetchScalarGridSpec(
            num_scalar_prefetch=0,
            grid=(nsteps,),
            in_specs=in_specs,
            out_specs=pl.BlockSpec((rows, VPAD), lambda i: (i, 0)),
        ),
        compiler_params=pltpu.CompilerParams(
            dimension_semantics=("parallel",)),
    )(idx_flat, emb, wqkv, wo, w1, w2, whead, vecs)

    return logits_pad.reshape(B, T, VPAD)[:, :, :VOCAB]


# ----------------------------- parameter init --------------------------------
def init_params(key):
    """Mirrors Model._init_weights: Linear/Embedding ~ N(0, 0.02), Linear bias 0,
    LayerNorm weight 1 / bias 0."""
    ks = jax.random.split(key, 16)
    n = lambda k, shape: (0.02 * jax.random.normal(k, shape)).astype(jnp.float32)
    zeros = lambda shape: jnp.zeros(shape, jnp.float32)
    ones = lambda shape: jnp.ones(shape, jnp.float32)
    return {
        "wte": n(ks[0], (VOCAB, D)),
        "wpe": n(ks[1], (BLOCK, D)),
        "ln1_w": ones((1, D)), "ln1_b": zeros((1, D)),
        "wq": n(ks[2], (D, D)), "bq": zeros((1, D)),
        "wk": n(ks[3], (D, D)), "bk": zeros((1, D)),
        "wv": n(ks[4], (D, D)), "bv": zeros((1, D)),
        "wo": n(ks[5], (D, D)), "bo": zeros((1, D)),
        "ln2_w": ones((1, D)), "ln2_b": zeros((1, D)),
        "w1": n(ks[6], (D, DFF)), "b1": zeros((1, DFF)),
        "w2": n(ks[7], (DFF, D)), "b2": zeros((1, D)),
        "lnf_w": ones((1, D)), "lnf_b": zeros((1, D)),
        "whead": n(ks[8], (D, VOCAB)),
    }


def model_forward(idx, params, targets=None):
    """Mirrors Model.forward(x, targets) -> (logits, Optional[loss])."""
    n_tc, mm_dtype = _chip_config()
    packed = pack_params(params, mm_dtype)
    logits = transformer_forward(idx, packed, n_tc)          # (B, T, VOCAB)

    loss = None
    if targets is not None:
        logp = jax.nn.log_softmax(logits.astype(jnp.float32), axis=-1)
        nll = -jnp.take_along_axis(logp, targets[..., None], axis=-1)[..., 0]
        loss = jnp.mean(nll)
    return logits, loss


# ---------------------------------- main -------------------------------------
if __name__ == "__main__":
    key = jax.random.PRNGKey(0)
    pkey, ikey, tkey = jax.random.split(key, 3)

    params = init_params(pkey)

    B, T = 4, BLOCK
    idx = jax.random.randint(ikey, (B, T), 0, VOCAB, dtype=jnp.int32)
    targets = jax.random.randint(tkey, (B, T), 0, VOCAB, dtype=jnp.int32)

    logits, loss = model_forward(idx, params, targets)
    logits = jax.block_until_ready(logits)
    loss = jax.block_until_ready(loss)

    assert logits.shape == (B, T, VOCAB)
    assert logits.dtype == jnp.float32
    assert bool(jnp.all(jnp.isfinite(logits)))
    assert jnp.isfinite(loss)
    print("KERNEL_OK")
</pallas_src>

<mosaic_0001>
module attributes {stable_mosaic.version = 11 : i64} {
  func.func @fused_forward_kernel(%arg0: i32, %arg1: memref<32x1xi32, #tpu.memory_space<vmem>>, %arg2: memref<40x32xf32, #tpu.memory_space<vmem>>, %arg3: memref<32x128xbf16, #tpu.memory_space<vmem>>, %arg4: memref<32x32xbf16, #tpu.memory_space<vmem>>, %arg5: memref<32x128xbf16, #tpu.memory_space<vmem>>, %arg6: memref<128x32xbf16, #tpu.memory_space<vmem>>, %arg7: memref<32x128xbf16, #tpu.memory_space<vmem>>, %arg8: memref<16x128xf32, #tpu.memory_space<vmem>>, %arg9: memref<32x128xf32, #tpu.memory_space<vmem>>) attributes {dimension_semantics = [#tpu.dimension_semantics<parallel>], iteration_bounds = array<i64: 1>, scalar_prefetch = 0 : i64, scratch_operands = 0 : i64, tpu.core_type = #tpu.core_type<tc>, window_params = [{transform_indices = @transform_0, window_bounds = array<i64: 32, 1>}, {pipeline_mode = #tpu.pipeline_mode<synchronous>, transform_indices = @transform_1, window_bounds = array<i64: 40, 32>}, {pipeline_mode = #tpu.pipeline_mode<synchronous>, transform_indices = @transform_2, window_bounds = array<i64: 32, 128>}, {pipeline_mode = #tpu.pipeline_mode<synchronous>, transform_indices = @transform_3, window_bounds = array<i64: 32, 32>}, {pipeline_mode = #tpu.pipeline_mode<synchronous>, transform_indices = @transform_4, window_bounds = array<i64: 32, 128>}, {pipeline_mode = #tpu.pipeline_mode<synchronous>, transform_indices = @transform_5, window_bounds = array<i64: 128, 32>}, {pipeline_mode = #tpu.pipeline_mode<synchronous>, transform_indices = @transform_6, window_bounds = array<i64: 32, 128>}, {pipeline_mode = #tpu.pipeline_mode<synchronous>, transform_indices = @transform_7, window_bounds = array<i64: 16, 128>}, {transform_indices = @transform_8, window_bounds = array<i64: 32, 128>}]} {
    %c0 = arith.constant 0 : index
    %c0_0 = arith.constant 0 : index
    %0 = vector.load %arg8[%c0, %c0_0] : memref<16x128xf32, #tpu.memory_space<vmem>>, vector<16x128xf32>
    %1 = vector.extract_strided_slice %0 {offsets = [0, 0], sizes = [16, 32], strides = [1, 1]} : vector<16x128xf32> to vector<16x32xf32>
    %2 = vector.extract_strided_slice %0 {offsets = [8, 0], sizes = [1, 128], strides = [1, 1]} : vector<16x128xf32> to vector<1x128xf32>
    %3 = vector.shape_cast %2 : vector<1x128xf32> to vector<128xf32>
    %4 = vector.extract_strided_slice %0 {offsets = [9, 0], sizes = [1, 128], strides = [1, 1]} : vector<16x128xf32> to vector<1x128xf32>
    %5 = vector.shape_cast %4 : vector<1x128xf32> to vector<128xf32>
    %c0_1 = arith.constant 0 : index
    %c0_2 = arith.constant 0 : index
    %6 = vector.load %arg2[%c0_1, %c0_2] : memref<40x32xf32, #tpu.memory_space<vmem>>, vector<40x32xf32>
    %c0_3 = arith.constant 0 : index
    %c0_4 = arith.constant 0 : index
    %7 = vector.load %arg1[%c0_3, %c0_4] : memref<32x1xi32, #tpu.memory_space<vmem>>, vector<32x1xi32>
    %8 = tpu.iota {dimensions = array<i32: 1>} : vector<32x32xi32>
    %9 = vector.broadcast %7 : vector<32x1xi32> to vector<32x32xi32>
    %10 = arith.cmpi eq, %9, %8 : vector<32x32xi32>
    %11 = arith.extui %10 : vector<32x32xi1> to vector<32x32xi32>
    %12 = arith.sitofp %11 : vector<32x32xi32> to vector<32x32xf32>
    %13 = vector.extract_strided_slice %6 {offsets = [0, 0], sizes = [32, 32], strides = [1, 1]} : vector<40x32xf32> to vector<32x32xf32>
    %cst = arith.constant dense<0.000000e+00> : vector<32x32xf32>
    %14 = tpu.matmul %12, %13, %cst {dimension_numbers = #tpu.dot_dimension_numbers<[1], [0], [0], [1], [0, 0, 1, 1], [], []>} : vector<32x32xf32>, vector<32x32xf32>, vector<32x32xf32> -> vector<32x32xf32>
    %15 = vector.extract_strided_slice %6 {offsets = [32, 0], sizes = [8, 32], strides = [1, 1]} : vector<40x32xf32> to vector<8x32xf32>
    %16 = vector.shape_cast %15 : vector<8x32xf32> to vector<1x8x32xf32>
    %17 = vector.shape_cast %16 : vector<1x8x32xf32> to vector<1x8x32xf32>
    %18 = vector.broadcast %17 : vector<1x8x32xf32> to vector<4x8x32xf32>
    %19 = vector.shape_cast %18 : vector<4x8x32xf32> to vector<32x32xf32>
    %20 = arith.addf %14, %19 : vector<32x32xf32>
    %21 = vector.extract_strided_slice %1 {offsets = [0, 0], sizes = [1, 32], strides = [1, 1]} : vector<16x32xf32> to vector<1x32xf32>
    %22 = vector.shape_cast %21 : vector<1x32xf32> to vector<32xf32>
    %23 = vector.extract_strided_slice %1 {offsets = [1, 0], sizes = [1, 32], strides = [1, 1]} : vector<16x32xf32> to vector<1x32xf32>
    %24 = vector.shape_cast %23 : vector<1x32xf32> to vector<32xf32>
    %cst_5 = arith.constant dense<0.000000e+00> : vector<32xf32>
    %25 = vector.multi_reduction <add>, %20, %cst_5 [1] : vector<32x32xf32> to vector<32xf32>
    %26 = vector.shape_cast %25 : vector<32xf32> to vector<32x1xf32>
    %cst_6 = arith.constant 3.200000e+01 : f32
    %27 = vector.broadcast %cst_6 : f32 to vector<32x1xf32>
    %28 = arith.divf %26, %27 : vector<32x1xf32>
    %29 = vector.broadcast %28 : vector<32x1xf32> to vector<32x32xf32>
    %30 = arith.subf %20, %29 : vector<32x32xf32>
    %31 = arith.mulf %30, %30 : vector<32x32xf32>
    %cst_7 = arith.constant dense<0.000000e+00> : vector<32xf32>
    %32 = vector.multi_reduction <add>, %31, %cst_7 [1] : vector<32x32xf32> to vector<32xf32>
    %33 = vector.shape_cast %32 : vector<32xf32> to vector<32x1xf32>
    %cst_8 = arith.constant 3.200000e+01 : f32
    %34 = vector.broadcast %cst_8 : f32 to vector<32x1xf32>
    %35 = arith.divf %33, %34 : vector<32x1xf32>
    %36 = vector.broadcast %28 : vector<32x1xf32> to vector<32x32xf32>
    %37 = arith.subf %20, %36 : vector<32x32xf32>
    %cst_9 = arith.constant 9.99999974E-6 : f32
    %38 = vector.broadcast %cst_9 : f32 to vector<32x1xf32>
    %39 = arith.addf %35, %38 : vector<32x1xf32>
    %40 = math.rsqrt %39 : vector<32x1xf32>
    %41 = vector.broadcast %40 : vector<32x1xf32> to vector<32x32xf32>
    %42 = arith.mulf %37, %41 : vector<32x32xf32>
    %43 = vector.shape_cast %22 : vector<32xf32> to vector<1x32xf32>
    %44 = vector.broadcast %43 : vector<1x32xf32> to vector<32x32xf32>
    %45 = arith.mulf %42, %44 : vector<32x32xf32>
    %46 = vector.shape_cast %24 : vector<32xf32> to vector<1x32xf32>
    %47 = vector.broadcast %46 : vector<1x32xf32> to vector<32x32xf32>
    %48 = arith.addf %45, %47 : vector<32x32xf32>
    %49 = arith.truncf %48 : vector<32x32xf32> to vector<32x32xbf16>
    %c0_10 = arith.constant 0 : index
    %c0_11 = arith.constant 0 : index
    %50 = vector.load %arg3[%c0_10, %c0_11] : memref<32x128xbf16, #tpu.memory_space<vmem>>, vector<32x128xbf16>
    %cst_12 = arith.constant dense<0.000000e+00> : vector<32x128xf32>
    %51 = tpu.matmul %49, %50, %cst_12 {dimension_numbers = #tpu.dot_dimension_numbers<[1], [0], [0], [1], [0, 0, 1, 1], [], []>} : vector<32x32xbf16>, vector<32x128xbf16>, vector<32x128xf32> -> vector<32x128xf32>
    %52 = vector.shape_cast %3 : vector<128xf32> to vector<1x128xf32>
    %53 = vector.broadcast %52 : vector<1x128xf32> to vector<32x128xf32>
    %54 = arith.addf %51, %53 : vector<32x128xf32>
    %55 = arith.truncf %54 : vector<32x128xf32> to vector<32x128xbf16>
    %56 = vector.extract_strided_slice %55 {offsets = [0, 0], sizes = [32, 32], strides = [1, 1]} : vector<32x128xbf16> to vector<32x32xbf16>
    %57 = vector.shape_cast %56 : vector<32x32xbf16> to vector<4x8x32xbf16>
    %58 = vector.extract_strided_slice %55 {offsets = [0, 32], sizes = [32, 32], strides = [1, 1]} : vector<32x128xbf16> to vector<32x32xbf16>
    %59 = vector.shape_cast %58 : vector<32x32xbf16> to vector<4x8x32xbf16>
    %60 = vector.extract_strided_slice %55 {offsets = [0, 64], sizes = [32, 32], strides = [1, 1]} : vector<32x128xbf16> to vector<32x32xbf16>
    %61 = vector.shape_cast %60 : vector<32x32xbf16> to vector<4x8x32xbf16>
    "tpu.trace_start"() <{level = 10 : i32, message = "bqd,bkd->bqk"}> : () -> ()
    %cst_13 = arith.constant dense<0.000000e+00> : vector<4x8x8xf32>
    %62 = tpu.matmul %57, %59, %cst_13 {dimension_numbers = #tpu.dot_dimension_numbers<[2], [2], [1], [1], [0, 0, 0, 1, 1, 1], [0], [0]>} : vector<4x8x32xbf16>, vector<4x8x32xbf16>, vector<4x8x8xf32> -> vector<4x8x8xf32>
    "tpu.trace_stop"() : () -> ()
    %63 = tpu.iota {dimensions = array<i32: 0>} : vector<8x8xi32>
    %64 = tpu.iota {dimensions = array<i32: 1>} : vector<8x8xi32>
    %65 = arith.cmpi sle, %64, %63 : vector<8x8xi32>
    %66 = vector.shape_cast %65 : vector<8x8xi1> to vector<1x8x8xi1>
    %cst_14 = arith.constant -1.000000e+30 : f32
    %67 = vector.shape_cast %66 : vector<1x8x8xi1> to vector<1x8x8xi1>
    %68 = vector.broadcast %67 : vector<1x8x8xi1> to vector<4x8x8xi1>
    %69 = vector.broadcast %cst_14 : f32 to vector<4x8x8xf32>
    %70 = arith.select %68, %62, %69 : vector<4x8x8xi1>, vector<4x8x8xf32>
    %cst_15 = arith.constant dense<0xFF800000> : vector<4x8xf32>
    %71 = vector.multi_reduction <maximumf>, %70, %cst_15 [2] : vector<4x8x8xf32> to vector<4x8xf32>
    %72 = vector.shape_cast %71 : vector<4x8xf32> to vector<4x8x1xf32>
    %73 = vector.broadcast %72 : vector<4x8x1xf32> to vector<4x8x8xf32>
    %74 = arith.subf %70, %73 : vector<4x8x8xf32>
    %75 = math.exp %74 : vector<4x8x8xf32>
    %cst_16 = arith.constant dense<0.000000e+00> : vector<4x8xf32>
    %76 = vector.multi_reduction <add>, %75, %cst_16 [2] : vector<4x8x8xf32> to vector<4x8xf32>
    %77 = vector.shape_cast %76 : vector<4x8xf32> to vector<4x8x1xf32>
    %78 = tpu.reciprocal %77 {approx = true} : vector<4x8x1xf32> -> vector<4x8x1xf32>
    %79 = vector.broadcast %78 : vector<4x8x1xf32> to vector<4x8x8xf32>
    %80 = arith.mulf %75, %79 : vector<4x8x8xf32>
    %81 = arith.truncf %80 : vector<4x8x8xf32> to vector<4x8x8xbf16>
    "tpu.trace_start"() <{level = 10 : i32, message = "bqk,bkd->bqd"}> : () -> ()
    %cst_17 = arith.constant dense<0.000000e+00> : vector<4x8x32xf32>
    %82 = tpu.matmul %81, %61, %cst_17 {dimension_numbers = #tpu.dot_dimension_numbers<[2], [1], [1], [2], [0, 0, 0, 1, 1, 2], [0], [0]>} : vector<4x8x8xbf16>, vector<4x8x32xbf16>, vector<4x8x32xf32> -> vector<4x8x32xf32>
    "tpu.trace_stop"() : () -> ()
    %83 = vector.shape_cast %82 : vector<4x8x32xf32> to vector<32x32xf32>
    %84 = arith.truncf %83 : vector<32x32xf32> to vector<32x32xbf16>
    %c0_18 = arith.constant 0 : index
    %c0_19 = arith.constant 0 : index
    %85 = vector.load %arg4[%c0_18, %c0_19] : memref<32x32xbf16, #tpu.memory_space<vmem>>, vector<32x32xbf16>
    %cst_20 = arith.constant dense<0.000000e+00> : vector<32x32xf32>
    %86 = tpu.matmul %84, %85, %cst_20 {dimension_numbers = #tpu.dot_dimension_numbers<[1], [0], [0], [1], [0, 0, 1, 1], [], []>} : vector<32x32xbf16>, vector<32x32xbf16>, vector<32x32xf32> -> vector<32x32xf32>
    %87 = vector.extract_strided_slice %1 {offsets = [2, 0], sizes = [1, 32], strides = [1, 1]} : vector<16x32xf32> to vector<1x32xf32>
    %88 = vector.shape_cast %87 : vector<1x32xf32> to vector<32xf32>
    %89 = vector.shape_cast %88 : vector<32xf32> to vector<1x32xf32>
    %90 = vector.broadcast %89 : vector<1x32xf32> to vector<32x32xf32>
    %91 = arith.addf %86, %90 : vector<32x32xf32>
    %92 = arith.addf %20, %91 : vector<32x32xf32>
    %93 = vector.extract_strided_slice %1 {offsets = [3, 0], sizes = [1, 32], strides = [1, 1]} : vector<16x32xf32> to vector<1x32xf32>
    %94 = vector.shape_cast %93 : vector<1x32xf32> to vector<32xf32>
    %95 = vector.extract_strided_slice %1 {offsets = [4, 0], sizes = [1, 32], strides = [1, 1]} : vector<16x32xf32> to vector<1x32xf32>
    %96 = vector.shape_cast %95 : vector<1x32xf32> to vector<32xf32>
    %cst_21 = arith.constant dense<0.000000e+00> : vector<32xf32>
    %97 = vector.multi_reduction <add>, %92, %cst_21 [1] : vector<32x32xf32> to vector<32xf32>
    %98 = vector.shape_cast %97 : vector<32xf32> to vector<32x1xf32>
    %cst_22 = arith.constant 3.200000e+01 : f32
    %99 = vector.broadcast %cst_22 : f32 to vector<32x1xf32>
    %100 = arith.divf %98, %99 : vector<32x1xf32>
    %101 = vector.broadcast %100 : vector<32x1xf32> to vector<32x32xf32>
    %102 = arith.subf %92, %101 : vector<32x32xf32>
    %103 = arith.mulf %102, %102 : vector<32x32xf32>
    %cst_23 = arith.constant dense<0.000000e+00> : vector<32xf32>
    %104 = vector.multi_reduction <add>, %103, %cst_23 [1] : vector<32x32xf32> to vector<32xf32>
    %105 = vector.shape_cast %104 : vector<32xf32> to vector<32x1xf32>
    %cst_24 = arith.constant 3.200000e+01 : f32
    %106 = vector.broadcast %cst_24 : f32 to vector<32x1xf32>
    %107 = arith.divf %105, %106 : vector<32x1xf32>
    %108 = vector.broadcast %100 : vector<32x1xf32> to vector<32x32xf32>
    %109 = arith.subf %92, %108 : vector<32x32xf32>
    %cst_25 = arith.constant 9.99999974E-6 : f32
    %110 = vector.broadcast %cst_25 : f32 to vector<32x1xf32>
    %111 = arith.addf %107, %110 : vector<32x1xf32>
    %112 = math.rsqrt %111 : vector<32x1xf32>
    %113 = vector.broadcast %112 : vector<32x1xf32> to vector<32x32xf32>
    %114 = arith.mulf %109, %113 : vector<32x32xf32>
    %115 = vector.shape_cast %94 : vector<32xf32> to vector<1x32xf32>
    %116 = vector.broadcast %115 : vector<1x32xf32> to vector<32x32xf32>
    %117 = arith.mulf %114, %116 : vector<32x32xf32>
    %118 = vector.shape_cast %96 : vector<32xf32> to vector<1x32xf32>
    %119 = vector.broadcast %118 : vector<1x32xf32> to vector<32x32xf32>
    %120 = arith.addf %117, %119 : vector<32x32xf32>
    %121 = arith.truncf %120 : vector<32x32xf32> to vector<32x32xbf16>
    %c0_26 = arith.constant 0 : index
    %c0_27 = arith.constant 0 : index
    %122 = vector.load %arg5[%c0_26, %c0_27] : memref<32x128xbf16, #tpu.memory_space<vmem>>, vector<32x128xbf16>
    %cst_28 = arith.constant dense<0.000000e+00> : vector<32x128xf32>
    %123 = tpu.matmul %121, %122, %cst_28 {dimension_numbers = #tpu.dot_dimension_numbers<[1], [0], [0], [1], [0, 0, 1, 1], [], []>} : vector<32x32xbf16>, vector<32x128xbf16>, vector<32x128xf32> -> vector<32x128xf32>
    %124 = vector.shape_cast %5 : vector<128xf32> to vector<1x128xf32>
    %125 = vector.broadcast %124 : vector<1x128xf32> to vector<32x128xf32>
    %126 = arith.addf %123, %125 : vector<32x128xf32>
    %cst_29 = arith.constant 5.000000e-01 : f32
    %127 = vector.broadcast %cst_29 : f32 to vector<32x128xf32>
    %128 = arith.mulf %127, %126 : vector<32x128xf32>
    %cst_30 = arith.constant 4.471500e-02 : f32
    %129 = vector.broadcast %cst_30 : f32 to vector<32x128xf32>
    %130 = arith.mulf %129, %126 : vector<32x128xf32>
    %131 = arith.mulf %130, %126 : vector<32x128xf32>
    %132 = arith.mulf %131, %126 : vector<32x128xf32>
    %133 = arith.addf %126, %132 : vector<32x128xf32>
    %cst_31 = arith.constant 0.797884583 : f32
    %134 = vector.broadcast %cst_31 : f32 to vector<32x128xf32>
    %135 = arith.mulf %134, %133 : vector<32x128xf32>
    %136 = math.tanh %135 : vector<32x128xf32>
    %cst_32 = arith.constant 1.000000e+00 : f32
    %137 = vector.broadcast %cst_32 : f32 to vector<32x128xf32>
    %138 = arith.addf %137, %136 : vector<32x128xf32>
    %139 = arith.mulf %128, %138 : vector<32x128xf32>
    %140 = arith.truncf %139 : vector<32x128xf32> to vector<32x128xbf16>
    %c0_33 = arith.constant 0 : index
    %c0_34 = arith.constant 0 : index
    %141 = vector.load %arg6[%c0_33, %c0_34] : memref<128x32xbf16, #tpu.memory_space<vmem>>, vector<128x32xbf16>
    %cst_35 = arith.constant dense<0.000000e+00> : vector<32x32xf32>
    %142 = tpu.matmul %140, %141, %cst_35 {dimension_numbers = #tpu.dot_dimension_numbers<[1], [0], [0], [1], [0, 0, 1, 1], [], []>} : vector<32x128xbf16>, vector<128x32xbf16>, vector<32x32xf32> -> vector<32x32xf32>
    %143 = arith.addf %92, %142 : vector<32x32xf32>
    %144 = vector.extract_strided_slice %1 {offsets = [5, 0], sizes = [1, 32], strides = [1, 1]} : vector<16x32xf32> to vector<1x32xf32>
    %145 = vector.shape_cast %144 : vector<1x32xf32> to vector<32xf32>
    %146 = vector.shape_cast %145 : vector<32xf32> to vector<1x32xf32>
    %147 = vector.broadcast %146 : vector<1x32xf32> to vector<32x32xf32>
    %148 = arith.addf %143, %147 : vector<32x32xf32>
    %149 = vector.extract_strided_slice %1 {offsets = [6, 0], sizes = [1, 32], strides = [1, 1]} : vector<16x32xf32> to vector<1x32xf32>
    %150 = vector.shape_cast %149 : vector<1x32xf32> to vector<32xf32>
    %151 = vector.extract_strided_slice %1 {offsets = [7, 0], sizes = [1, 32], strides = [1, 1]} : vector<16x32xf32> to vector<1x32xf32>
    %152 = vector.shape_cast %151 : vector<1x32xf32> to vector<32xf32>
    %cst_36 = arith.constant dense<0.000000e+00> : vector<32xf32>
    %153 = vector.multi_reduction <add>, %148, %cst_36 [1] : vector<32x32xf32> to vector<32xf32>
    %154 = vector.shape_cast %153 : vector<32xf32> to vector<32x1xf32>
    %cst_37 = arith.constant 3.200000e+01 : f32
    %155 = vector.broadcast %cst_37 : f32 to vector<32x1xf32>
    %156 = arith.divf %154, %155 : vector<32x1xf32>
    %157 = vector.broadcast %156 : vector<32x1xf32> to vector<32x32xf32>
    %158 = arith.subf %148, %157 : vector<32x32xf32>
    %159 = arith.mulf %158, %158 : vector<32x32xf32>
    %cst_38 = arith.constant dense<0.000000e+00> : vector<32xf32>
    %160 = vector.multi_reduction <add>, %159, %cst_38 [1] : vector<32x32xf32> to vector<32xf32>
    %161 = vector.shape_cast %160 : vector<32xf32> to vector<32x1xf32>
    %cst_39 = arith.constant 3.200000e+01 : f32
    %162 = vector.broadcast %cst_39 : f32 to vector<32x1xf32>
    %163 = arith.divf %161, %162 : vector<32x1xf32>
    %164 = vector.broadcast %156 : vector<32x1xf32> to vector<32x32xf32>
    %165 = arith.subf %148, %164 : vector<32x32xf32>
    %cst_40 = arith.constant 9.99999974E-6 : f32
    %166 = vector.broadcast %cst_40 : f32 to vector<32x1xf32>
    %167 = arith.addf %163, %166 : vector<32x1xf32>
    %168 = math.rsqrt %167 : vector<32x1xf32>
    %169 = vector.broadcast %168 : vector<32x1xf32> to vector<32x32xf32>
    %170 = arith.mulf %165, %169 : vector<32x32xf32>
    %171 = vector.shape_cast %150 : vector<32xf32> to vector<1x32xf32>
    %172 = vector.broadcast %171 : vector<1x32xf32> to vector<32x32xf32>
    %173 = arith.mulf %170, %172 : vector<32x32xf32>
    %174 = vector.shape_cast %152 : vector<32xf32> to vector<1x32xf32>
    %175 = vector.broadcast %174 : vector<1x32xf32> to vector<32x32xf32>
    %176 = arith.addf %173, %175 : vector<32x32xf32>
    %177 = arith.truncf %176 : vector<32x32xf32> to vector<32x32xbf16>
    %c0_41 = arith.constant 0 : index
    %c0_42 = arith.constant 0 : index
    %178 = vector.load %arg7[%c0_41, %c0_42] : memref<32x128xbf16, #tpu.memory_space<vmem>>, vector<32x128xbf16>
    %cst_43 = arith.constant dense<0.000000e+00> : vector<32x128xf32>
    %179 = tpu.matmul %177, %178, %cst_43 {dimension_numbers = #tpu.dot_dimension_numbers<[1], [0], [0], [1], [0, 0, 1, 1], [], []>} : vector<32x32xbf16>, vector<32x128xbf16>, vector<32x128xf32> -> vector<32x128xf32>
    %c0_44 = arith.constant 0 : index
    %c0_45 = arith.constant 0 : index
    %180 = vector.load %arg9[%c0_44, %c0_45] : memref<32x128xf32, #tpu.memory_space<vmem>>, vector<32x128xf32>
    tpu.vector_store %arg9[%c0_44, %c0_45], %179 {strides = array<i32>} : memref<32x128xf32, #tpu.memory_space<vmem>>, vector<32x128xf32>,
    return
  }
  func.func @transform_0(%arg0: i32) -> (i32, i32) {
    %c0_i32 = arith.constant 0 : i32
    %c0_i32_0 = arith.constant 0 : i32
    return %arg0, %c0_i32 : i32, i32
  }
  func.func @transform_1(%arg0: i32) -> (i32, i32) {
    %c0_i32 = arith.constant 0 : i32
    %c0_i32_0 = arith.constant 0 : i32
    %c0_i32_1 = arith.constant 0 : i32
    return %c0_i32, %c0_i32_0 : i32, i32
  }
  func.func @transform_2(%arg0: i32) -> (i32, i32) {
    %c0_i32 = arith.constant 0 : i32
    %c0_i32_0 = arith.constant 0 : i32
    %c0_i32_1 = arith.constant 0 : i32
    return %c0_i32, %c0_i32_0 : i32, i32
  }
  func.func @transform_3(%arg0: i32) -> (i32, i32) {
    %c0_i32 = arith.constant 0 : i32
    %c0_i32_0 = arith.constant 0 : i32
    %c0_i32_1 = arith.constant 0 : i32
    return %c0_i32, %c0_i32_0 : i32, i32
  }
  func.func @transform_4(%arg0: i32) -> (i32, i32) {
    %c0_i32 = arith.constant 0 : i32
    %c0_i32_0 = arith.constant 0 : i32
    %c0_i32_1 = arith.constant 0 : i32
    return %c0_i32, %c0_i32_0 : i32, i32
  }
  func.func @transform_5(%arg0: i32) -> (i32, i32) {
    %c0_i32 = arith.constant 0 : i32
    %c0_i32_0 = arith.constant 0 : i32
    %c0_i32_1 = arith.constant 0 : i32
    return %c0_i32, %c0_i32_0 : i32, i32
  }
  func.func @transform_6(%arg0: i32) -> (i32, i32) {
    %c0_i32 = arith.constant 0 : i32
    %c0_i32_0 = arith.constant 0 : i32
    %c0_i32_1 = arith.constant 0 : i32
    return %c0_i32, %c0_i32_0 : i32, i32
  }
  func.func @transform_7(%arg0: i32) -> (i32, i32) {
    %c0_i32 = arith.constant 0 : i32
    %c0_i32_0 = arith.constant 0 : i32
    %c0_i32_1 = arith.constant 0 : i32
    return %c0_i32, %c0_i32_0 : i32, i32
  }
  func.func @transform_8(%arg0: i32) -> (i32, i32) {
    %c0_i32 = arith.constant 0 : i32
    %c0_i32_0 = arith.constant 0 : i32
    return %arg0, %c0_i32 : i32, i32
  }
}

</mosaic_0001>

<bundles_post_ra>
// kernel: tpu_custom_call.1
= control target key start
LH: loop header
LB: loop body
LE: loop exit
PB: predicated region body
PF: predicated region fallthrough
CT: control target
= control target key end

     0   :  { %v1625_v2 = vmov 0   ;;  %v1626_v8 = vmov 0.0   ;;  %s1964_s0 = inlined_call_operand.vmem [shape: s32[32,1], index: 0, kind: input, shape index: {}]   ;;  %s1965_s1 = inlined_call_operand.vmem [shape: f32[40,32], index: 1, kind: input, shape index: {}]   ;;  %s1966_s2 = inlined_call_operand.vmem [shape: bf16[32,128], index: 2, kind: input, shape index: {}]   ;;  %s1967_s3 = inlined_call_operand.vmem [shape: bf16[32,32], index: 3, kind: input, shape index: {}]   ;;  %s1968_s4 = inlined_call_operand.vmem [shape: bf16[32,128], index: 4, kind: input, shape index: {}]   ;;  %s1969_s5 = inlined_call_operand.vmem [shape: bf16[128,32], index: 5, kind: input, shape index: {}]   ;;  %s1970_s6 = inlined_call_operand.vmem [shape: bf16[32,128], index: 6, kind: input, shape index: {}]   ;;  %s1971_s7 = inlined_call_operand.vmem [shape: f32[16,128], index: 7, kind: input, shape index: {}]   ;;  %s1972_s8 = inlined_call_operand.hbm [shape: f32[32,128], index: 8, kind: output, shape index: {}]  }
   0x1   :  { %v40_v0 = vld [vmem:[%s1964_s0 + $0x10] sm:$0xff]  ;;  %v38_v1 = vld [vmem:[%s1964_s0] sm:$0xff]  ;;  %1538 = vset.pattern.permute.xlu1 %v1625_v2  ;;  %1537 = vset.pattern.permute.xlu0 %v1625_v2  ;;  %v41_v3 = vld [vmem:[%s1964_s0 + $0x18] sm:$0xff] }
   0x2   :  { %v36_v4 = vld [vmem:[%s1965_s1 + $0x18] sm:$0xff]  ;;  %51 = vperm.xlu1 %1538, %v40_v0   ;;  %45 = vperm.xlu0 %1537, %v38_v1   ;;  %v39_v5 = vld [vmem:[%s1964_s0 + $0x8] sm:$0xff]  ;;  %v35_v6 = vld [vmem:[%s1965_s1 + $0x10] sm:$0xff] }
   0x3   :  { %1415 = vmatprep.subr.mxu1 %v36_v4  ;;  %v34_v7 = vld [vmem:[%s1965_s1 + $0x8] sm:$0xff]  ;;  %1437 = vmatprep.subr.bf16.mxu0 %v1626_v8  ;;  %v33_v9 = vld [vmem:[%s1965_s1] sm:$0xff] }
   0x4   :  { %1416 = vmatpush3.msra.mxu1 %v36_v4 }
   0x5   :  { %1417 = vmatprep.subr.mxu1 %v35_v6 }
   0x6   :  { %54 = vperm.xlu1 %1538, %v41_v3   ;;  %48 = vperm.xlu0 %1537, %v39_v5  }
   0x7   :  { %1418 = vmatpush3.msra.mxu1 %v35_v6 }
   0x8   :  { %1419 = vmatprep.subr.mxu1 %v34_v7 }
   0x9   :  { %1420 = vmatpush3.msra.mxu1 %v34_v7 }
   0xa   :  { %1421 = vmatprep.subr.mxu1 %v33_v9 }
   0xb   :  { %1422 = vmatpush3.msra.mxu1 %v33_v9 }
   0xc   :  { %13 = vsyncpa [#allocation3], 0  ;;  %v42_v10 = vlaneseq  ;;  %vm68_vm0 = vcmask 261120   ;;  %v37_v20 = vld [vmem:[%s1965_s1 + $0x20] sm:$0xff]  ;;  %v1539_v53 = vld [vmem:[%s1966_s2 + $0x8] sm:$0xff]   ;;  %vm1627_vm5 = vmmov 0  }
   0xd   :  { %1429 = vmatprep.subr.bf16.mxu1 %v1539_v53  ;;  %v1540_v54 = vld [vmem:[%s1966_s2] sm:$0xff]   ;;  %1439 = vmatprep.mubr.msk.bf16.mxu0 %vm1627_vm5, %v1626_v8  ;;  %vm525_vm7 = vcmask 64512   ;;  %s1629_s28 = smov 64   ;;  %vm579_vm8 = vcmask 1043456  }
   0xe   :  { %v1704_v11 = vand.u32 127, %v42_v10  ;;  %v1753_v63 = vshrl.u32 %v42_v10, 7  ;;  %v1759_v5 = vld [vmem:[%s1971_s7] sm:$0xff] }
  0x10   :  { %v221_v3 = vsub.s32 0, %v1753_v63  ;;  %v229_v7 = vsub.s32 1, %v1753_v63  ;;  %vm518_vm6 = vcmp.le.s32.totalorder %v1704_v11, %v1753_v63 }
  0x12   :  { %v222_v6 = vrot.slane %v1759_v5, %v221_v3 }
  0x7d   :  { %v52_v12 = vpop.permute.xlu1 %51  ;;  %v46_v13 = vpop.permute.xlu0 %45 }
  0x7e   :  { %vm56_vm1 = vcmp.eq.s32.totalorder %v46_v13, %v1704_v11  ;;  %vm58_vm2 = vcmp.eq.s32.totalorder %v52_v12, %v1704_v11 }
  0x7f   :  { %v1317_v14 = vsel %vm56_vm1, 1.0, %v1626_v8  ;;  %v1319_v17 = vsel %vm58_vm2, 1.0, %v1626_v8 }
  0x80   :  { %1423 = vmatprep.mubr.msk.f32.mxu1 %vm68_vm0, %v1317_v14 }
  0x81   :  { %v55_v15 = vpop.permute.xlu1 %54  ;;  %v49_v16 = vpop.permute.xlu0 %48 }
  0x82   :  { %vm57_vm3 = vcmp.eq.s32.totalorder %v49_v16, %v1704_v11  ;;  %vm59_vm4 = vcmp.eq.s32.totalorder %v55_v15, %v1704_v11  ;;  %v230_v15 = vrot.slane %v1759_v5, %v229_v7 }
  0x83   :  { %v1318_v18 = vsel %vm57_vm3, 1.0, %v1626_v8  ;;  %v1320_v19 = vsel %vm59_vm4, 1.0, %v1626_v8 }
  0x84   :  { %1424 = vmatmul.mubr.msk.f32.vlgmr.msra.gmra.mxu1 %vm68_vm0, %v1318_v18 }
  0x85   :  { %1426 = vmatprep.mubr.msk.f32.mxu1 %vm68_vm0, %v1319_v17  ;;  %1430 = vmatpush3.bf16.msra.mxu1 %v1539_v53 }
  0x86   :  { %1431 = vmatprep.subr.bf16.mxu1 %v1540_v54 }
  0x88   :  { %1427 = vmatmul.mubr.msk.f32.gmra.mxu1 %vm68_vm0, %v1320_v19 }
  0x89   :  { %1432 = vmatpush3.bf16.msra.mxu1 %v1540_v54 }
  0x8a   :  { %1443 = vmatprep.subr.bf16.mxu1 %v1626_v8 }
 0x144   :  { %v1425_v21 = vpop.f32.mrf.mxu1 }
 0x145   :  { %v1721_v22 = vadd.f32 %v1425_v21, %v37_v20 }
 0x146   :  { %v147_v23 = vpop.f32.mrf.mxu1 }
 0x147   :  { %v1723_v24 = vadd.f32 %v147_v23, %v37_v20  ;;  %v169_v25 = vsel %vm68_vm0, %v1721_v22, 0.0 }
 0x148   :  { %170 = vadd.xlane.f32.xlu1 %v169_v25  ;;  %v1428_v26 = vpop.f32.mrf.mxu1 }
 0x149   :  { %v166_v27 = vsel %vm68_vm0, %v1723_v24, 0.0  ;;  %v1731_v30 = vadd.f32 %v1428_v26, %v37_v20 }
 0x14a   :  { %v157_v28 = vpop.f32.mrf.mxu1  ;;  %167 = vadd.xlane.f32.xlu0 %v166_v27 }
 0x14b   :  { %v1729_v29 = vadd.f32 %v157_v28, %v37_v20  ;;  %v175_v32 = vsel %vm68_vm0, %v1731_v30, 0.0 }
 0x14d   :  { %v172_v31 = vsel %vm68_vm0, %v1729_v29, 0.0 }
 0x14e   :  { %173 = vadd.xlane.f32.xlu0 %v172_v31 }
 0x152   :  { %176 = vadd.xlane.f32.xlu0 %v175_v32 }
 0x1d1   :  { %v171_v33 = vpop.xlane.xlu1 %170 }
 0x1d2   :  { %v180_v34 = vmul.f32 0.03125, %v171_v33  ;;  %v1771_v33 = vld [vmem:[%s1971_s7 + $0x8] sm:$0xff]  ;;  %s1628_s7 = smov 96  }
 0x1d3   :  { %v168_v35 = vpop.xlane.xlu0 %167 }
 0x1d4   :  { %v184_v36 = vsub.f32 %v1721_v22, %v180_v34  ;;  %v179_v37 = vmul.f32 0.03125, %v168_v35  ;;  %v244_v35 = vrot.slane %v1771_v33, %v221_v3 }
 0x1d6   :  { %v183_v38 = vsub.f32 %v1723_v24, %v179_v37  ;;  %v188_v39 = vmul.f32 %v184_v36, %v184_v36 }
 0x1d7   :  { %v174_v40 = vpop.xlane.xlu0 %173 }
 0x1d8   :  { %v181_v41 = vmul.f32 0.03125, %v174_v40  ;;  %v194_v42 = vsel %vm68_vm0, %v188_v39, 0.0  ;;  %v187_v43 = vmul.f32 %v183_v38, %v183_v38 }
 0x1d9   :  { %195 = vadd.xlane.f32.xlu0 %v194_v42 }
 0x1da   :  { %v185_v44 = vsub.f32 %v1729_v29, %v181_v41  ;;  %v191_v45 = vsel %vm68_vm0, %v187_v43, 0.0 }
 0x1db   :  { %192 = vadd.xlane.f32.xlu1 %v191_v45  ;;  %v177_v46 = vpop.xlane.xlu0 %176 }
 0x1dc   :  { %v182_v47 = vmul.f32 0.03125, %v177_v46  ;;  %v189_v48 = vmul.f32 %v185_v44, %v185_v44 }
 0x1de   :  { %v186_v49 = vsub.f32 %v1731_v30, %v182_v47  ;;  %v197_v50 = vsel %vm68_vm0, %v189_v48, 0.0 }
 0x1df   :  { %198 = vadd.xlane.f32.xlu1 %v197_v50 }
 0x1e0   :  { %v190_v51 = vmul.f32 %v186_v49, %v186_v49 }
 0x1e2   :  { %v200_v52 = vsel %vm68_vm0, %v190_v51, 0.0 }
 0x1e3   :  { %201 = vadd.xlane.f32.xlu0 %v200_v52 }
 0x262   :  { %v196_v55 = vpop.xlane.xlu0 %195 }
 0x263   :  { %v204_v56 = vmul.f32 0.03125, %v196_v55 }
 0x264   :  { %v193_v57 = vpop.xlane.xlu1 %192 }
 0x265   :  { %v208_v58 = vadd.f32 1e-05, %v204_v56  ;;  %v203_v59 = vmul.f32 0.03125, %v193_v57 }
 0x267   :  { %1555 = vrsqrt.f32 %v208_v58  ;;  %v207_v60 = vadd.f32 1e-05, %v203_v59 }
 0x268   :  { %v199_v61 = vpop.xlane.xlu1 %198 }
 0x269   :  { %1557 = vrsqrt.f32 %v207_v60  ;;  %v205_v62 = vmul.f32 0.03125, %v199_v61 }
 0x26b   :  { %v209_v0 = vadd.f32 1e-05, %v205_v62 }
 0x26c   :  { %v202_v1 = vpop.xlane.xlu0 %201 }
 0x26d   :  { %1559 = vrsqrt.f32 %v209_v0  ;;  %v206_v2 = vmul.f32 0.03125, %v202_v1 }
 0x26f   :  { %v210_v4 = vadd.f32 1e-05, %v206_v2 }
 0x271   :  { %1561 = vrsqrt.f32 %v210_v4 }
 0x274   :  { %v1556_v9 = vpop.eup %1555 }
 0x275   :  { %v216_v10 = vmul.f32 %v1556_v9, %v184_v36 }
 0x276   :  { %v1558_v12 = vpop.eup %1557 }
 0x277   :  { %v215_v13 = vmul.f32 %v1558_v12, %v183_v38  ;;  %v224_v14 = vmul.f32 %v222_v6, %v216_v10 }
 0x279   :  { %v223_v16 = vmul.f32 %v222_v6, %v215_v13  ;;  %v232_v20 = vadd.f32 %v230_v15, %v224_v14 }
 0x27a   :  { %v1560_v17 = vpop.eup %1559 }
 0x27b   :  { %v217_v18 = vmul.f32 %v1560_v17, %v185_v44  ;;  %v231_v19 = vadd.f32 %v230_v15, %v223_v16 }
 0x27d   :  { %v235_v21 = vpack.c.bf16 %v232_v20, %v231_v19  ;;  %v225_v25 = vmul.f32 %v222_v6, %v217_v18 }
 0x27e   :  { %v1562_v23 = vpop.eup %1561 }
 0x27f   :  { %v218_v26 = vmul.f32 %v1562_v23, %v186_v49  ;;  %1433 = vmatprep.mubr.msk.bf16.mxu1 %vm68_vm0, %v235_v21  ;;  %v233_v28 = vadd.f32 %v230_v15, %v225_v25 }
 0x281   :  { %v226_v27 = vmul.f32 %v222_v6, %v218_v26 }
 0x283   :  { %v234_v31 = vadd.f32 %v230_v15, %v226_v27 }
 0x285   :  { %v236_v32 = vpack.c.bf16 %v234_v31, %v233_v28 }
 0x287   :  { %1434 = vmatmul.mubr.msk.bf16.vlgmr.msra.gmra.mxu1 %vm68_vm0, %v236_v32 }
 0x288   :  { %1445 = vmatprep.mubr.msk.bf16.mxu1 %vm1627_vm5, %v1626_v8 }
 0x347   :  { %v1435_v34 = vpop.f32.mrf.mxu1 }
 0x348   :  { %v306_v39 = vadd.f32 %v1435_v34, %v244_v35 }
 0x349   :  { %v297_v36 = vpop.f32.mrf.mxu1 }
 0x34a   :  { %v298_v37 = vadd.f32 %v297_v36, %v244_v35  ;;  %v1781_v43 = vpack.c.bf16 %v306_v39, %v306_v39 }
 0x34b   :  { %v1436_v38 = vpop.f32.mrf.mxu1 }
 0x34c   :  { %v1778_v40 = vpack.c.bf16 %v298_v37, %v298_v37  ;;  %v309_v44 = vadd.f32 %v1436_v38, %v244_v35 }
 0x34d   :  { %v300_v41 = vpop.f32.mrf.mxu1 }
 0x34e   :  { %v301_v42 = vadd.f32 %v300_v41, %v244_v35  ;;  %324 = vrot.lane.b32.xlu1 %v1778_v40, %s1628_s7  ;;  %v1787_v46 = vpack.c.bf16 %v309_v44, %v309_v44 }
 0x350   :  { %v1783_v45 = vpack.c.bf16 %v301_v42, %v301_v42 }
 0x352   :  { %372 = vrot.lane.b32.xlu0 %v1783_v45, %s1628_s7  ;;  %420 = vrot.lane.b32.xlu1 %v1781_v43, %s1628_s7 }
 0x356   :  { %468 = vrot.lane.b32.xlu1 %v1787_v46, %s1628_s7 }
 0x3c0   :  { %v325_v47 = vpop.permute.xlu1 %324 }
 0x3c1   :  { %v330_v48 = vsel %vm68_vm0, %v325_v47, 0 }
 0x3c2   :  { %1438 = vmatpush3.bf16.xpose.msra.mxu0 %v330_v48 }
 0x3c3   :  { %1449 = vmatprep.subr.bf16.mxu0 %v1626_v8 }
 0x3c4   :  { %v373_v49 = vpop.permute.xlu0 %372  ;;  %v421_v50 = vpop.permute.xlu1 %420 }
 0x3c5   :  { %v378_v51 = vsel %vm68_vm0, %v373_v49, 0  ;;  %v426_v52 = vsel %vm68_vm0, %v421_v50, 0 }
 0x3c6   :  { %1444 = vmatpush3.bf16.xpose.msra.mxu1 %v378_v51 }
 0x3c7   :  { %1455 = vmatprep.subr.bf16.mxu1 %v1626_v8 }
 0x3c8   :  { %v469_v53 = vpop.permute.xlu1 %468 }
 0x3c9   :  { %1440 = vmatmul.mubr.msk.bf16.vlgmr.msra.gmra.mxu0 %vm68_vm0, %v1778_v40  ;;  %v474_v54 = vsel %vm68_vm0, %v469_v53, 0 }
 0x3ca   :  { %1450 = vmatpush3.bf16.xpose.msra.mxu0 %v426_v52  ;;  %1451 = vmatprep.mubr.msk.bf16.mxu0 %vm1627_vm5, %v1626_v8 }
 0x3cb   :  { %1461 = vmatprep.subr.bf16.mxu0 %v1626_v8 }
 0x3cd   :  { %1446 = vmatmul.mubr.msk.bf16.vlgmr.msra.gmra.mxu1 %vm68_vm0, %v1783_v45 }
 0x3ce   :  { %1456 = vmatpush3.bf16.xpose.msra.mxu1 %v474_v54  ;;  %1457 = vmatprep.mubr.msk.bf16.mxu1 %vm1627_vm5, %v1626_v8 }
 0x3cf   :  { %1467 = vmatprep.subr.bf16.mxu1 %v1626_v8 }
 0x3d1   :  { %1452 = vmatmul.mubr.msk.bf16.vlgmr.msra.gmra.mxu0 %vm68_vm0, %v1781_v43 }
 0x3d2   :  { %1463 = vmatprep.mubr.msk.bf16.mxu0 %vm1627_vm5, %v1626_v8 }
 0x3d5   :  { %1458 = vmatmul.mubr.msk.bf16.vlgmr.msra.gmra.mxu1 %vm68_vm0, %v1787_v46 }
 0x3d6   :  { %1469 = vmatprep.mubr.msk.bf16.mxu1 %vm1627_vm5, %v1626_v8 }
 0x489   :  { %v366_v55 = vpop.f32.mrf.mxu0 }
 0x48a   :  { %v521_v56 = vsel %vm518_vm6, %v366_v55, -1e+30 }
 0x48b   :  { %v1441_v57 = vpop.f32.mrf.mxu0  ;;  %v526_v58 = vsel %vm525_vm7, %v521_v56, -inf }
 0x48c   :  { %527 = vmax.xlane.f32.xlu0 %v526_v58 }
 0x48d   :  { %v369_v59 = vpop.f32.mrf.mxu0  ;;  %v414_v60 = vpop.f32.mrf.mxu1 }
 0x48e   :  { %v522_v61 = vsel %vm518_vm6, %v414_v60, -1e+30 }
 0x48f   :  { %v1442_v62 = vpop.f32.mrf.mxu0  ;;  %v1447_v0 = vpop.f32.mrf.mxu1  ;;  %v529_v1 = vsel %vm525_vm7, %v522_v61, -inf }
 0x490   :  { %530 = vmax.xlane.f32.xlu1 %v529_v1 }
 0x491   :  { %v417_v2 = vpop.f32.mrf.mxu1  ;;  %v462_v3 = vpop.f32.mrf.mxu0 }
 0x492   :  { %v523_v4 = vsel %vm518_vm6, %v462_v3, -1e+30 }
 0x493   :  { %v1448_v6 = vpop.f32.mrf.mxu1  ;;  %v1453_v9 = vpop.f32.mrf.mxu0  ;;  %v532_v10 = vsel %vm525_vm7, %v523_v4, -inf }
 0x494   :  { %533 = vmax.xlane.f32.xlu0 %v532_v10  ;;  %v1541_v6 = vld [vmem:[%s1967_s3 + $0x8] sm:$0xff]   ;;  %v1542_v9 = vld [vmem:[%s1967_s3] sm:$0xff]  }
 0x495   :  { %v465_v12 = vpop.f32.mrf.mxu0  ;;  %v510_v13 = vpop.f32.mrf.mxu1 }
 0x496   :  { %v524_v14 = vsel %vm518_vm6, %v510_v13, -1e+30 }
 0x497   :  { %v1454_v15 = vpop.f32.mrf.mxu0  ;;  %v1459_v16 = vpop.f32.mrf.mxu1  ;;  %v535_v17 = vsel %vm525_vm7, %v524_v14, -inf }
 0x498   :  { %536 = vmax.xlane.f32.xlu0 %v535_v17 }
 0x499   :  { %v513_v18 = vpop.f32.mrf.mxu1 }
 0x49b   :  { %v1460_v19 = vpop.f32.mrf.mxu1 }
 0x4a1   :  { %574 = vrot.lane.b32.xlu1 %v1778_v40, %s1629_s28 }
 0x515   :  { %v528_v20 = vpop.xlane.xlu0 %527 }
 0x516   :  { %v538_v21 = vsub.f32 %v521_v56, %v528_v20 }
 0x518   :  { %v542_v23 = vmul.f32 1.442695, %v538_v21 }
 0x519   :  { %v531_v25 = vpop.xlane.xlu1 %530 }
 0x51a   :  { %1563 = vpow2.f32 %v542_v23  ;;  %v539_v26 = vsub.f32 %v522_v61, %v531_v25 }
 0x51c   :  { %v544_v11 = vmul.f32 1.442695, %v539_v26 }
 0x51d   :  { %v534_v27 = vpop.xlane.xlu0 %533  ;;  %v575_v28 = vpop.permute.xlu1 %574 }
 0x51e   :  { %1565 = vpow2.f32 %v544_v11  ;;  %v540_v31 = vsub.f32 %v523_v4, %v534_v27  ;;  %v581_v32 = vsel %vm579_vm8, %v575_v28, 0 }
 0x51f   :  { %1462 = vmatpush3.bf16.msra.mxu0 %v581_v32 }
 0x520   :  { %v546_v34 = vmul.f32 1.442695, %v540_v31  ;;  %1473 = vmatprep.subr.bf16.mxu0 %v1626_v8  ;;  %v775_v31 = vsub.s32 2, %v1753_v63 }
 0x521   :  { %v537_v35 = vpop.xlane.xlu0 %536 }
 0x522   :  { %1567 = vpow2.f32 %v546_v34  ;;  %v541_v36 = vsub.f32 %v524_v14, %v537_v35  ;;  %v776_v32 = vrot.slane %v1759_v5, %v775_v31 }
 0x524   :  { %v548_v37 = vmul.f32 1.442695, %v541_v36 }
 0x526   :  { %1569 = vpow2.f32 %v548_v37 }
 0x527   :  { %v1564_v38 = vpop.eup %1563 }
 0x528   :  { %v550_v39 = vsel %vm525_vm7, %v1564_v38, 0.0 }
 0x529   :  { %551 = vadd.xlane.f32.xlu1 %v550_v39 }
 0x52b   :  { %v1566_v40 = vpop.eup %1565 }
 0x52c   :  { %v553_v41 = vsel %vm525_vm7, %v1566_v40, 0.0 }
 0x52d   :  { %554 = vadd.xlane.f32.xlu0 %v553_v41 }
 0x52f   :  { %v1568_v42 = vpop.eup %1567 }
 0x530   :  { %v556_v44 = vsel %vm525_vm7, %v1568_v42, 0.0 }
 0x531   :  { %557 = vadd.xlane.f32.xlu1 %v556_v44 }
 0x533   :  { %v1570_v47 = vpop.eup %1569 }
 0x534   :  { %v559_v48 = vsel %vm525_vm7, %v1570_v47, 0.0 }
 0x535   :  { %560 = vadd.xlane.f32.xlu0 %v559_v48 }
 0x542   :  { %671 = vrot.lane.b32.xlu1 %v1781_v43, %s1629_s28 }
 0x546   :  { %719 = vrot.lane.b32.xlu1 %v1787_v46, %s1629_s28 }
 0x54b   :  { %623 = vrot.lane.b32.xlu0 %v1783_v45, %s1629_s28 }
 0x5b2   :  { %v552_v49 = vpop.xlane.xlu1 %551 }
 0x5b3   :  { %1571 = vrcp.f32 %v552_v49 }
 0x5b6   :  { %v555_v50 = vpop.xlane.xlu0 %554 }
 0x5b7   :  { %1573 = vrcp.f32 %v555_v50 }
 0x5ba   :  { %v558_v51 = vpop.xlane.xlu1 %557 }
 0x5bb   :  { %1575 = vrcp.f32 %v558_v51 }
 0x5be   :  { %v561_v52 = vpop.xlane.xlu0 %560  ;;  %v672_v54 = vpop.permute.xlu1 %671 }
 0x5bf   :  { %1577 = vrcp.f32 %v561_v52  ;;  %v677_v46 = vsel %vm579_vm8, %v672_v54, 0 }
 0x5c0   :  { %v1572_v53 = vpop.eup %1571 }
 0x5c1   :  { %v566_v55 = vmul.f32 %v1572_v53, %v1564_v38 }
 0x5c2   :  { %v624_v56 = vpop.permute.xlu0 %623  ;;  %v720_v59 = vpop.permute.xlu1 %719 }
 0x5c3   :  { %v629_v43 = vsel %vm579_vm8, %v624_v56, 0  ;;  %v570_v57 = vpack.c.bf16 %v566_v55, %v566_v55  ;;  %v725_v62 = vsel %vm579_vm8, %v720_v59, 0 }
 0x5c4   :  { %v1574_v58 = vpop.eup %1573  ;;  %1468 = vmatpush3.bf16.msra.mxu1 %v629_v43 }
 0x5c5   :  { %1464 = vmatmul.mubr.msk.bf16.vlgmr.msra.gmra.mxu0 %vm525_vm7, %v570_v57  ;;  %1479 = vmatprep.subr.bf16.mxu1 %v1626_v8  ;;  %v567_v45 = vmul.f32 %v1574_v58, %v1566_v40 }
 0x5c6   :  { %1474 = vmatpush3.bf16.msra.mxu0 %v677_v46  ;;  %1475 = vmatprep.mubr.msk.bf16.mxu0 %vm1627_vm5, %v1626_v8 }
 0x5c7   :  { %v571_v60 = vpack.c.bf16 %v567_v45, %v567_v45  ;;  %1485 = vmatprep.subr.bf16.mxu0 %v1541_v6 }
 0x5c8   :  { %v1576_v61 = vpop.eup %1575 }
 0x5c9   :  { %1470 = vmatmul.mubr.msk.bf16.vlgmr.msra.gmra.mxu1 %vm525_vm7, %v571_v60  ;;  %v568_v0 = vmul.f32 %v1576_v61, %v1568_v42 }
 0x5ca   :  { %1480 = vmatpush3.bf16.msra.mxu1 %v725_v62  ;;  %1481 = vmatprep.mubr.msk.bf16.mxu1 %vm1627_vm5, %v1626_v8 }
 0x5cb   :  { %v572_v1 = vpack.c.bf16 %v568_v0, %v568_v0 }
 0x5cc   :  { %v1578_v2 = vpop.eup %1577 }
 0x5cd   :  { %1476 = vmatmul.mubr.msk.bf16.vlgmr.msra.gmra.mxu0 %vm525_vm7, %v572_v1  ;;  %v569_v3 = vmul.f32 %v1578_v2, %v1570_v47 }
 0x5ce   :  { %1486 = vmatpush3.bf16.msra.mxu0 %v1541_v6 }
 0x5cf   :  { %v573_v4 = vpack.c.bf16 %v569_v3, %v569_v3  ;;  %1487 = vmatprep.subr.bf16.mxu0 %v1542_v9  ;;  %v1543_v3 = vld [vmem:[%s1968_s4 + $0x8] sm:$0xff]  }
 0x5d0   :  { %1493 = vmatprep.subr.bf16.mxu1 %v1543_v3 }
 0x5d1   :  { %1482 = vmatmul.mubr.msk.bf16.vlgmr.msra.gmra.mxu1 %vm525_vm7, %v573_v4  ;;  %v1544_v4 = vld [vmem:[%s1968_s4] sm:$0xff]  }
 0x5d2   :  { %1488 = vmatpush3.bf16.msra.mxu0 %v1542_v9  ;;  %1494 = vmatpush3.bf16.msra.mxu1 %v1543_v3 }
 0x5d3   :  { %1495 = vmatprep.subr.bf16.mxu1 %v1544_v4 }
 0x5d6   :  { %1496 = vmatpush3.bf16.msra.mxu1 %v1544_v4 }
 0x685   :  { %v617_v8 = vpop.f32.mrf.mxu0 }
 0x687   :  { %v1465_v10 = vpop.f32.mrf.mxu0 }
 0x689   :  { %v620_v12 = vpop.f32.mrf.mxu0  ;;  %v665_v13 = vpop.f32.mrf.mxu1 }
 0x68a   :  { %v767_v14 = vpack.c.bf16 %v665_v13, %v617_v8 }
 0x68b   :  { %v1466_v15 = vpop.f32.mrf.mxu0  ;;  %v1471_v16 = vpop.f32.mrf.mxu1 }
 0x68c   :  { %1489 = vmatprep.mubr.msk.bf16.mxu0 %vm68_vm0, %v767_v14 }
 0x68d   :  { %v668_v17 = vpop.f32.mrf.mxu1  ;;  %v713_v18 = vpop.f32.mrf.mxu0 }
 0x68f   :  { %v1472_v19 = vpop.f32.mrf.mxu1  ;;  %v1477_v20 = vpop.f32.mrf.mxu0 }
 0x690   :  { %v902_v20 = vsub.s32 3, %v1753_v63 }
 0x691   :  { %v716_v21 = vpop.f32.mrf.mxu0  ;;  %v761_v23 = vpop.f32.mrf.mxu1 }
 0x692   :  { %v768_v25 = vpack.c.bf16 %v761_v23, %v713_v18 }
 0x693   :  { %v1478_v26 = vpop.f32.mrf.mxu0  ;;  %v1483_v11 = vpop.f32.mrf.mxu1 }
 0x694   :  { %1490 = vmatmul.mubr.msk.bf16.vlgmr.msra.gmra.mxu0 %vm68_vm0, %v768_v25  ;;  %v903_v25 = vrot.slane %v1759_v5, %v902_v20  ;;  %v910_v26 = vsub.s32 4, %v1753_v63 }
 0x695   :  { %v764_v27 = vpop.f32.mrf.mxu1 }
 0x697   :  { %v1484_v28 = vpop.f32.mrf.mxu1 }
 0x754   :  { %v1491_v34 = vpop.f32.mrf.mxu0 }
 0x755   :  { %v838_v36 = vadd.f32 %v1491_v34, %v776_v32  ;;  %v911_v34 = vrot.slane %v1759_v5, %v910_v26 }
 0x756   :  { %v829_v35 = vpop.f32.mrf.mxu0 }
 0x757   :  { %v830_v37 = vadd.f32 %v829_v35, %v776_v32  ;;  %v1872_v41 = vadd.f32 %v838_v36, %v1729_v29 }
 0x758   :  { %v1492_v38 = vpop.f32.mrf.mxu0 }
 0x759   :  { %v1869_v39 = vadd.f32 %v830_v37, %v1723_v24  ;;  %v841_v42 = vadd.f32 %v1492_v38, %v776_v32  ;;  %v854_v50 = vsel %vm68_vm0, %v1872_v41, 0.0 }
 0x75a   :  { %v832_v40 = vpop.f32.mrf.mxu0 }
 0x75b   :  { %v833_v44 = vadd.f32 %v832_v40, %v776_v32  ;;  %v848_v47 = vsel %vm68_vm0, %v1869_v39, 0.0  ;;  %v1880_v49 = vadd.f32 %v841_v42, %v1731_v30 }
 0x75c   :  { %849 = vadd.xlane.f32.xlu0 %v848_v47 }
 0x75d   :  { %v1877_v48 = vadd.f32 %v833_v44, %v1721_v22  ;;  %v857_v29 = vsel %vm68_vm0, %v1880_v49, 0.0 }
 0x75f   :  { %v851_v24 = vsel %vm68_vm0, %v1877_v48, 0.0 }
 0x760   :  { %852 = vadd.xlane.f32.xlu1 %v851_v24  ;;  %855 = vadd.xlane.f32.xlu0 %v854_v50 }
 0x764   :  { %858 = vadd.xlane.f32.xlu0 %v857_v29 }
 0x7e5   :  { %v850_v51 = vpop.xlane.xlu0 %849 }
 0x7e6   :  { %v860_v52 = vmul.f32 0.03125, %v850_v51  ;;  %v1545_v51 = vld [vmem:[%s1969_s5 + $0x38] sm:$0xff]  }
 0x7e7   :  { %1501 = vmatprep.subr.bf16.mxu0 %v1545_v51 }
 0x7e8   :  { %v864_v22 = vsub.f32 %v1869_v39, %v860_v52  ;;  %1502 = vmatpush3.bf16.msra.mxu0 %v1545_v51  ;;  %v1546_v52 = vld [vmem:[%s1969_s5 + $0x30] sm:$0xff]  }
 0x7e9   :  { %v853_v53 = vpop.xlane.xlu1 %852  ;;  %v856_v54 = vpop.xlane.xlu0 %855  ;;  %1503 = vmatprep.subr.bf16.mxu0 %v1546_v52 }
 0x7ea   :  { %v861_v30 = vmul.f32 0.03125, %v853_v53  ;;  %v862_v55 = vmul.f32 0.03125, %v856_v54  ;;  %v868_v56 = vmul.f32 %v864_v22, %v864_v22  ;;  %v1548_v53 = vld [vmem:[%s1969_s5 + $0x20] sm:$0xff]   ;;  %v1549_v54 = vld [vmem:[%s1969_s5 + $0x18] sm:$0xff]  }
 0x7ec   :  { %v865_v43 = vsub.f32 %v1877_v48, %v861_v30  ;;  %v866_v57 = vsub.f32 %v1872_v41, %v862_v55  ;;  %v872_v58 = vsel %vm68_vm0, %v868_v56, 0.0  ;;  %1504 = vmatpush3.bf16.msra.mxu0 %v1546_v52  ;;  %v1550_v30 = vld [vmem:[%s1969_s5 + $0x10] sm:$0xff]   ;;  %v1551_v55 = vld [vmem:[%s1969_s5 + $0x8] sm:$0xff]   ;;  %v1552_v56 = vld [vmem:[%s1969_s5] sm:$0xff]  }
 0x7ed   :  { %873 = vadd.xlane.f32.xlu1 %v872_v58  ;;  %v859_v46 = vpop.xlane.xlu0 %858 }
 0x7ee   :  { %v863_v45 = vmul.f32 0.03125, %v859_v46  ;;  %v869_v59 = vmul.f32 %v865_v43, %v865_v43  ;;  %v870_v60 = vmul.f32 %v866_v57, %v866_v57 }
 0x7f0   :  { %v867_v61 = vsub.f32 %v1880_v49, %v863_v45  ;;  %v875_v62 = vsel %vm68_vm0, %v869_v59, 0.0  ;;  %v878_v0 = vsel %vm68_vm0, %v870_v60, 0.0 }
 0x7f1   :  { %876 = vadd.xlane.f32.xlu0 %v875_v62  ;;  %879 = vadd.xlane.f32.xlu1 %v878_v0 }
 0x7f2   :  { %v871_v1 = vmul.f32 %v867_v61, %v867_v61 }
 0x7f4   :  { %v881_v2 = vsel %vm68_vm0, %v871_v1, 0.0 }
 0x7f5   :  { %882 = vadd.xlane.f32.xlu0 %v881_v2 }
 0x876   :  { %v874_v6 = vpop.xlane.xlu1 %873 }
 0x877   :  { %v884_v9 = vmul.f32 0.03125, %v874_v6 }
 0x879   :  { %v888_v8 = vadd.f32 1e-05, %v884_v9 }
 0x87a   :  { %v880_v10 = vpop.xlane.xlu1 %879  ;;  %v877_v12 = vpop.xlane.xlu0 %876 }
 0x87b   :  { %1579 = vrsqrt.f32 %v888_v8  ;;  %v886_v13 = vmul.f32 0.03125, %v880_v10  ;;  %v885_v14 = vmul.f32 0.03125, %v877_v12 }
 0x87d   :  { %v890_v15 = vadd.f32 1e-05, %v886_v13  ;;  %v889_v16 = vadd.f32 1e-05, %v885_v14 }
 0x87e   :  { %v883_v17 = vpop.xlane.xlu0 %882 }
 0x87f   :  { %1581 = vrsqrt.f32 %v890_v15  ;;  %v887_v18 = vmul.f32 0.03125, %v883_v17 }
 0x880   :  { %1583 = vrsqrt.f32 %v889_v16 }
 0x881   :  { %v891_v19 = vadd.f32 1e-05, %v887_v18 }
 0x883   :  { %1585 = vrsqrt.f32 %v891_v19 }
 0x888   :  { %v1580_v21 = vpop.eup %1579 }
 0x889   :  { %v896_v23 = vmul.f32 %v1580_v21, %v864_v22  ;;  %v1547_v22 = vld [vmem:[%s1969_s5 + $0x28] sm:$0xff]  }
 0x88a   :  { %1505 = vmatprep.subr.bf16.mxu0 %v1547_v22 }
 0x88b   :  { %v904_v32 = vmul.f32 %v903_v25, %v896_v23  ;;  %1506 = vmatpush3.bf16.msra.mxu0 %v1547_v22 }
 0x88c   :  { %v1582_v11 = vpop.eup %1581  ;;  %1507 = vmatprep.subr.bf16.mxu0 %v1548_v53 }
 0x88d   :  { %v1584_v27 = vpop.eup %1583  ;;  %v898_v28 = vmul.f32 %v1582_v11, %v866_v57  ;;  %v912_v40 = vadd.f32 %v911_v34, %v904_v32 }
 0x88e   :  { %v897_v31 = vmul.f32 %v1584_v27, %v865_v43  ;;  %v925_v43 = vrot.slane %v1771_v33, %v229_v7 }
 0x88f   :  { %v906_v38 = vmul.f32 %v903_v25, %v898_v28  ;;  %1508 = vmatpush3.bf16.msra.mxu0 %v1548_v53 }
 0x890   :  { %v1586_v35 = vpop.eup %1585  ;;  %v905_v36 = vmul.f32 %v903_v25, %v897_v31  ;;  %1509 = vmatprep.subr.bf16.mxu0 %v1549_v54 }
 0x891   :  { %v899_v37 = vmul.f32 %v1586_v35, %v867_v61  ;;  %v914_v24 = vadd.f32 %v911_v34, %v906_v38 }
 0x892   :  { %v913_v42 = vadd.f32 %v911_v34, %v905_v36 }
 0x893   :  { %v907_v44 = vmul.f32 %v903_v25, %v899_v37  ;;  %1510 = vmatpush3.bf16.msra.mxu0 %v1549_v54 }
 0x894   :  { %v916_v47 = vpack.c.bf16 %v913_v42, %v912_v40  ;;  %1511 = vmatprep.subr.bf16.mxu0 %v1550_v30 }
 0x895   :  { %v915_v50 = vadd.f32 %v911_v34, %v907_v44 }
 0x896   :  { %1497 = vmatprep.mubr.msk.bf16.mxu1 %vm68_vm0, %v916_v47 }
 0x897   :  { %v917_v29 = vpack.c.bf16 %v915_v50, %v914_v24  ;;  %1512 = vmatpush3.bf16.msra.mxu0 %v1550_v30  ;;  %v1150_v24 = vsub.s32 5, %v1753_v63 }
 0x898   :  { %1513 = vmatprep.subr.bf16.mxu0 %v1551_v55 }
 0x899   :  { %1498 = vmatmul.mubr.msk.bf16.vlgmr.msra.gmra.mxu1 %vm68_vm0, %v917_v29  ;;  %v1151_v22 = vrot.slane %v1759_v5, %v1150_v24 }
 0x89b   :  { %1514 = vmatpush3.bf16.msra.mxu0 %v1551_v55 }
 0x89c   :  { %1515 = vmatprep.subr.bf16.mxu0 %v1552_v56 }
 0x89f   :  { %1516 = vmatpush3.bf16.msra.mxu0 %v1552_v56 }
 0x959   :  { %v1499_v57 = vpop.f32.mrf.mxu1 }
 0x95a   :  { %v987_v58 = vadd.f32 %v1499_v57, %v925_v43 }
 0x95b   :  { %v978_v46 = vpop.f32.mrf.mxu1 }
 0x95c   :  { %v999_v45 = vmul.f32 0.044715, %v987_v58  ;;  %v979_v59 = vadd.f32 %v978_v46, %v925_v43  ;;  %v995_v36 = vmul.f32 0.5, %v987_v58 }
 0x95d   :  { %v1500_v60 = vpop.f32.mrf.mxu1 }
 0x95e   :  { %v1003_v61 = vmul.f32 %v999_v45, %v987_v58  ;;  %v997_v62 = vmul.f32 0.044715, %v979_v59  ;;  %v990_v0 = vadd.f32 %v1500_v60, %v925_v43  ;;  %v993_v32 = vmul.f32 0.5, %v979_v59 }
 0x95f   :  { %v981_v1 = vpop.f32.mrf.mxu1 }
 0x960   :  { %v1007_v2 = vmul.f32 %v1003_v61, %v987_v58  ;;  %v1001_v3 = vmul.f32 %v997_v62, %v979_v59  ;;  %v1000_v4 = vmul.f32 0.044715, %v990_v0  ;;  %v982_v6 = vadd.f32 %v981_v1, %v925_v43 }
 0x961   :  { %v996_v28 = vmul.f32 0.5, %v990_v0 }
 0x962   :  { %v1011_v9 = vadd.f32 %v1007_v2, %v987_v58  ;;  %v1005_v8 = vmul.f32 %v1001_v3, %v979_v59  ;;  %v1004_v10 = vmul.f32 %v1000_v4, %v990_v0  ;;  %v998_v12 = vmul.f32 0.044715, %v982_v6 }
 0x963   :  { %v994_v34 = vmul.f32 0.5, %v982_v6 }
 0x964   :  { %v1008_v13 = vmul.f32 %v1004_v10, %v990_v0  ;;  %v1002_v7 = vmul.f32 %v998_v12, %v982_v6  ;;  %v1009_v33 = vadd.f32 %v1005_v8, %v979_v59  ;;  %v1015_v14 = vmul.f32 0.7978846, %v1011_v9 }
 0x966   :  { %v1012_v15 = vadd.f32 %v1008_v13, %v990_v0  ;;  %v1006_v16 = vmul.f32 %v1002_v7, %v982_v6  ;;  %v1013_v17 = vmul.f32 0.7978846, %v1009_v33 }
 0x968   :  { %v1016_v18 = vmul.f32 0.7978846, %v1012_v15  ;;  %v1010_v19 = vadd.f32 %v1006_v16, %v982_v6  ;;  %1587 = vtanh.f32 %v1013_v17  ;;  %v1553_v15 = vld [vmem:[%s1970_s6 + $0x8] sm:$0xff]   ;;  %v1554_v16 = vld [vmem:[%s1970_s6] sm:$0xff]   ;;  %s1630_s6 = smov [#allocation2]  }
 0x969   :  { %1589 = vtanh.f32 %v1015_v14  ;;  %1521 = vmatprep.subr.bf16.mxu1 %v1553_v15  ;;  %s1306_s28 = sshll.u32 %s1630_s6, 4  ;;  %s1307_s28 = int_to_ptr.vmem [resolvable:$true] %s1306_s28 }
 0x96a   :  { %1591 = vtanh.f32 %v1016_v18  ;;  %v1014_v20 = vmul.f32 0.7978846, %v1010_v19  ;;  %1522 = vmatpush3.bf16.msra.mxu1 %v1553_v15  ;;  %s1603_s29 = scalar_lea.vmem %s1307_s28, 512  ;;  %p1608_p1 = scmp.lt.s32.totalorder %s1307_s28, %s1307_s28 }
 0x96b   :  { %1523 = vmatprep.subr.bf16.mxu1 %v1554_v16  ;;  %p1604_p0 = scmp.ne.s32.totalorder %s1307_s28, %s1603_s29  ;;  %p1609_p2 = scmp.lt.s32.totalorder %s1603_s29, %s1603_s29 }
 0x96c   :  { %1593 = vtanh.f32 %v1014_v20 }
 0x96d   :  { %p1610_p3 = por %p1609_p2, %p1608_p1 }
 0x96e   :  { %1524 = vmatpush3.bf16.msra.mxu1 %v1554_v16 }
 0x96f   :  { %p1611_p4 = pnand %p1610_p3, %p1604_p0 }
 0x975   :  { %v1588_v21 = vpop.eup %1587 }
 0x976   :  { %v1590_v23 = vpop.eup %1589  ;;  %v1021_v26 = vadd.f32 1.0, %v1588_v21 }
 0x977   :  { %v1592_v25 = vpop.eup %1591  ;;  %v1023_v31 = vadd.f32 1.0, %v1590_v23 }
 0x978   :  { %v1024_v11 = vadd.f32 1.0, %v1592_v25  ;;  %v1025_v38 = vmul.f32 %v1021_v26, %v993_v32  ;;  %v1210_v32 = vsub.s32 6, %v1753_v63 }
 0x979   :  { %v1594_v27 = vpop.eup %1593  ;;  %v1027_v42 = vmul.f32 %v1023_v31, %v995_v36 }
 0x97a   :  { %v1022_v35 = vadd.f32 1.0, %v1594_v27  ;;  %v1028_v37 = vmul.f32 %v1024_v11, %v996_v28  ;;  %v1211_v36 = vrot.slane %v1759_v5, %v1210_v32 }
 0x97c   :  { %v1026_v40 = vmul.f32 %v1022_v35, %v994_v34  ;;  %v1030_v47 = vpack.c.bf16 %v1028_v37, %v1027_v42  ;;  %v1218_v37 = vsub.s32 7, %v1753_v63 }
 0x97e   :  { %v1029_v44 = vpack.c.bf16 %v1026_v40, %v1025_v38  ;;  %v1219_v24 = vrot.slane %v1759_v5, %v1218_v37 }
 0x980   :  { %1517 = vmatprep.mubr.bf16.mxu0 %v1029_v44 }
 0x981   :  { %1518 = vmatmul.mubr.bf16.vlgmr.msra.gmra.mxu0 %v1030_v47 }
 0xa41   :  { %v1519_v50 = vpop.f32.mrf.mxu0 }
 0xa42   :  { %v1146_v51 = vadd.f32 %v1519_v50, %v1872_v41 }
 0xa43   :  { %v1129_v29 = vpop.f32.mrf.mxu0 }
 0xa44   :  { %v1144_v52 = vadd.f32 %v1129_v29, %v1869_v39  ;;  %v1154_v57 = vadd.f32 %v1151_v22, %v1146_v51 }
 0xa45   :  { %v1520_v53 = vpop.f32.mrf.mxu0 }
 0xa46   :  { %v1152_v54 = vadd.f32 %v1151_v22, %v1144_v52  ;;  %v1147_v55 = vadd.f32 %v1520_v53, %v1880_v49  ;;  %v1162_v46 = vsel %vm68_vm0, %v1154_v57, 0.0 }
 0xa47   :  { %v1132_v30 = vpop.f32.mrf.mxu0 }
 0xa48   :  { %v1145_v56 = vadd.f32 %v1132_v30, %v1877_v48  ;;  %v1156_v43 = vsel %vm68_vm0, %v1152_v54, 0.0  ;;  %v1155_v45 = vadd.f32 %v1151_v22, %v1147_v55 }
 0xa49   :  { %1157 = vadd.xlane.f32.xlu1 %v1156_v43 }
 0xa4a   :  { %v1153_v58 = vadd.f32 %v1151_v22, %v1145_v56  ;;  %v1165_v39 = vsel %vm68_vm0, %v1155_v45, 0.0 }
 0xa4c   :  { %v1159_v41 = vsel %vm68_vm0, %v1153_v58, 0.0 }
 0xa4d   :  { %1163 = vadd.xlane.f32.xlu1 %v1162_v46  ;;  %1160 = vadd.xlane.f32.xlu0 %v1159_v41 }
 0xa51   :  { %1166 = vadd.xlane.f32.xlu0 %v1165_v39 }
 0xad2   :  { %v1158_v59 = vpop.xlane.xlu1 %1157 }
 0xad3   :  { %v1168_v60 = vmul.f32 0.03125, %v1158_v59 }
 0xad5   :  { %v1172_v49 = vsub.f32 %v1152_v54, %v1168_v60 }
 0xad6   :  { %v1164_v61 = vpop.xlane.xlu1 %1163  ;;  %v1161_v48 = vpop.xlane.xlu0 %1160 }
 0xad7   :  { %v1170_v62 = vmul.f32 0.03125, %v1164_v61  ;;  %v1169_v0 = vmul.f32 0.03125, %v1161_v48  ;;  %v1176_v1 = vmul.f32 %v1172_v49, %v1172_v49 }
 0xad9   :  { %v1174_v2 = vsub.f32 %v1154_v57, %v1170_v62  ;;  %v1173_v3 = vsub.f32 %v1153_v58, %v1169_v0  ;;  %v1180_v4 = vsel %vm68_vm0, %v1176_v1, 0.0 }
 0xada   :  { %1181 = vadd.xlane.f32.xlu1 %v1180_v4  ;;  %v1167_v6 = vpop.xlane.xlu0 %1166 }
 0xadb   :  { %v1171_v9 = vmul.f32 0.03125, %v1167_v6  ;;  %v1178_v8 = vmul.f32 %v1174_v2, %v1174_v2  ;;  %v1177_v10 = vmul.f32 %v1173_v3, %v1173_v3 }
 0xadd   :  { %v1175_v12 = vsub.f32 %v1155_v45, %v1171_v9  ;;  %v1186_v13 = vsel %vm68_vm0, %v1178_v8, 0.0  ;;  %v1183_v7 = vsel %vm68_vm0, %v1177_v10, 0.0 }
 0xade   :  { %1187 = vadd.xlane.f32.xlu1 %v1186_v13  ;;  %1184 = vadd.xlane.f32.xlu0 %v1183_v7 }
 0xadf   :  { %v1179_v33 = vmul.f32 %v1175_v12, %v1175_v12 }
 0xae1   :  { %v1189_v14 = vsel %vm68_vm0, %v1179_v33, 0.0 }
 0xae2   :  { %1190 = vadd.xlane.f32.xlu0 %v1189_v14 }
 0xb63   :  { %v1182_v17 = vpop.xlane.xlu1 %1181 }
 0xb64   :  { %v1192_v18 = vmul.f32 0.03125, %v1182_v17 }
 0xb66   :  { %v1196_v19 = vadd.f32 1e-05, %v1192_v18 }
 0xb67   :  { %v1188_v20 = vpop.xlane.xlu1 %1187  ;;  %v1185_v21 = vpop.xlane.xlu0 %1184 }
 0xb68   :  { %1595 = vrsqrt.f32 %v1196_v19  ;;  %v1194_v23 = vmul.f32 0.03125, %v1188_v20  ;;  %v1193_v25 = vmul.f32 0.03125, %v1185_v21 }
 0xb6a   :  { %v1198_v26 = vadd.f32 1e-05, %v1194_v23  ;;  %v1197_v11 = vadd.f32 1e-05, %v1193_v25 }
 0xb6b   :  { %v1191_v27 = vpop.xlane.xlu0 %1190 }
 0xb6c   :  { %1597 = vrsqrt.f32 %v1198_v26  ;;  %v1195_v28 = vmul.f32 0.03125, %v1191_v27 }
 0xb6d   :  { %1599 = vrsqrt.f32 %v1197_v11 }
 0xb6e   :  { %v1199_v31 = vadd.f32 1e-05, %v1195_v28 }
 0xb70   :  { %1601 = vrsqrt.f32 %v1199_v31 }
 0xb75   :  { %v1596_v34 = vpop.eup %1595 }
 0xb76   :  { %v1204_v35 = vmul.f32 %v1596_v34, %v1172_v49 }
 0xb78   :  { %v1212_v47 = vmul.f32 %v1211_v36, %v1204_v35 }
 0xb79   :  { %v1598_v38 = vpop.eup %1597 }
 0xb7a   :  { %v1600_v40 = vpop.eup %1599  ;;  %v1206_v42 = vmul.f32 %v1598_v38, %v1174_v2  ;;  %v1220_v22 = vadd.f32 %v1219_v24, %v1212_v47 }
 0xb7b   :  { %v1205_v44 = vmul.f32 %v1600_v40, %v1173_v3 }
 0xb7c   :  { %v1214_v52 = vmul.f32 %v1211_v36, %v1206_v42 }
 0xb7d   :  { %v1602_v50 = vpop.eup %1601  ;;  %v1213_v29 = vmul.f32 %v1211_v36, %v1205_v44 }
 0xb7e   :  { %v1207_v51 = vmul.f32 %v1602_v50, %v1175_v12  ;;  %v1222_v55 = vadd.f32 %v1219_v24, %v1214_v52 }
 0xb7f   :  { %v1221_v53 = vadd.f32 %v1219_v24, %v1213_v29 }
 0xb80   :  { %v1215_v54 = vmul.f32 %v1211_v36, %v1207_v51 }
 0xb81   :  { %v1224_v30 = vpack.c.bf16 %v1221_v53, %v1220_v22 }
 0xb82   :  { %v1223_v56 = vadd.f32 %v1219_v24, %v1215_v54 }
 0xb83   :  { %1525 = vmatprep.mubr.msk.bf16.mxu1 %vm68_vm0, %v1224_v30 }
 0xb84   :  { %v1225_v63 = vpack.c.bf16 %v1223_v56, %v1222_v55 }
 0xb86   :  { %1526 = vmatmul.mubr.msk.bf16.vlgmr.msra.gmra.mxu1 %vm68_vm0, %v1225_v63 }
 0xc46   :  { %v1527_v43 = vpop.f32.mrf.mxu1 }
 0xc47   :  { %1299 = vst [vmem:[#allocation2 + $0x10] sm:$0xff] %v1527_v43 }
 0xc48   :  { %v1282_v57 = vpop.f32.mrf.mxu1 }
 0xc49   :  { %1297 = vst [vmem:[#allocation2] sm:$0xff] %v1282_v57 }
 0xc4a   :  { %v1528_v5 = vpop.f32.mrf.mxu1 }
 0xc4b   :  { %1300 = vst [vmem:[#allocation2 + $0x18] sm:$0xff] %v1528_v5 }
 0xc4c   :  { %v1285_v58 = vpop.f32.mrf.mxu1 }
 0xc4d   :  { %1298 = vst [vmem:[#allocation2 + $0x8] sm:$0xff] %v1285_v58 }
 0xc4e   :  { %1614 = shalt.err (!%p1611_p4)
}
 0xc4f   :  { %s1631_s30 = smov 128   ;;  %s1632_s9 = smov 8  }
 0xc50   :  { %1312 = dma.vmem_to_hbm [thread:$0]  %s1307_s28, 512, %s1972_s8, [#allocation3], %s1631_s30, %s1631_s30, %s1632_s9  }
 0xc51   :  { %1623 = dma.done.wait [#allocation3], 512  }
 0xc52   :  { %1624 = vsyncadd [#allocation3], 4294966784 }
 0xc53   :  { %1316 = vsyncpa [#allocation3], 1 }

</bundles_post_ra>
